<compile_context>
chip_gen: v5e
topology: v5e:2x2
jax: 0.10.0
libtpu: 0.0.40
codegen_flags: <defaults>
</compile_context>

<pallas_src>
import functools

import numpy as np
import jax
import jax.numpy as jnp
from jax.experimental import pallas as pl
from jax.experimental.pallas import tpu as pltpu

try:
    from scipy.optimize import linear_sum_assignment as _scipy_lsa
except Exception:  # pragma: no cover - scipy optional
    _scipy_lsa = None

_OUT_LANES = 128  # lane-dense packed scalar row: lanes [0,1,2] = (cls, l1, iou) loss


def _round_up(x, m):
    return ((x + m - 1) // m) * m


# ----------------------------------------------------------------------------
# Shared GIoU helper (traced inside kernels; works both pairwise [T,1]x[1,G]
# and element-wise [1,N]x[1,N] via broadcasting).
# ----------------------------------------------------------------------------
def _giou(px0, py0, px1, py1, gx0, gy0, gx1, gy1, *, approx):
    area1 = jnp.maximum((px1 - px0) * (py1 - py0), 0.0)
    area2 = jnp.maximum((gx1 - gx0) * (gy1 - gy0), 0.0)
    iw = jnp.maximum(jnp.minimum(px1, gx1) - jnp.maximum(px0, gx0), 0.0)
    ih = jnp.maximum(jnp.minimum(py1, gy1) - jnp.maximum(py0, gy0), 0.0)
    inter = jnp.maximum(iw * ih, 0.0)
    union = jnp.maximum(area1 + area2 - inter, 0.0001)
    ew = jnp.maximum(jnp.maximum(px1, gx1) - jnp.minimum(px0, gx0), 0.0)
    eh = jnp.maximum(jnp.maximum(py1, gy1) - jnp.minimum(py0, gy0), 0.0)
    earea = jnp.maximum(ew * eh, 0.0001)
    if approx:
        # matching cost only: EUP reciprocal keeps this off the VALU path
        iou = inter * pl.reciprocal(union, approx=True)
        return iou - (earea - union) * pl.reciprocal(earea, approx=True)
    # reported losses: exact division for parity with the PyTorch reference
    iou = inter / union
    return iou - (earea - union) / earea


# ----------------------------------------------------------------------------
# Pallas kernels
# ----------------------------------------------------------------------------
def _cost_matrix_kernel(cls_ref, reg_ref, gt_ref, onehot_ref, out_ref, *,
                        cls_cost_w, box_cost_w, giou_cost_w):
    # cls_ref    : [T, Cp]  logits (last decoder level), class dim padded with -1e9
    # reg_ref    : [T, 4]   raw cxcywh (clamped in-kernel)
    # gt_ref     : [4, Gp]  gt boxes cxcywh, gt dim padded to a multiple of 128
    # onehot_ref : [Cp, Gp] f32 one-hot of gt labels (padded gt columns all-zero)
    # out_ref    : [T, Gp]  lane-dense cost matrix tile
    logits = cls_ref[...]
    m = jnp.max(logits, axis=-1, keepdims=True)
    e = jnp.exp(logits - m)                                        # padded classes -> 0
    p = e * pl.reciprocal(jnp.sum(e, axis=-1, keepdims=True), approx=True)
    p = jnp.clip(p, 0.0001, 1.0 - 0.0001)                          # matches torch.clamp

    # class gather p[:, gt_labels] as one MXU matmul against the [Cp, Gp] one-hot.
    cls_cost = -jnp.dot(p, onehot_ref[...], preferred_element_type=jnp.float32)

    reg = jnp.clip(reg_ref[...], 0.0001, 1.0 - 0.0001)             # [T, 4]
    gt = gt_ref[...]                                               # [4, Gp]

    # L1 cdist: [T, Gp]
    box_cost = (jnp.abs(reg[:, 0:1] - gt[0:1, :]) +
                jnp.abs(reg[:, 1:2] - gt[1:2, :]) +
                jnp.abs(reg[:, 2:3] - gt[2:3, :]) +
                jnp.abs(reg[:, 3:4] - gt[3:4, :]))

    pcx, pcy, pw, ph = reg[:, 0:1], reg[:, 1:2], reg[:, 2:3], reg[:, 3:4]
    gcx, gcy, gw, gh = gt[0:1, :], gt[1:2, :], gt[2:3, :], gt[3:4, :]
    giou = _giou(pcx - 0.5 * pw, pcy - 0.5 * ph, pcx + 0.5 * pw, pcy + 0.5 * ph,
                 gcx - 0.5 * gw, gcy - 0.5 * gh, gcx + 0.5 * gw, gcy + 0.5 * gh,
                 approx=True)

    out_ref[...] = (cls_cost_w * cls_cost + box_cost_w * box_cost
                    + giou_cost_w * (-giou))


def _fused_level_loss_kernel(cls_ref, matched_ref, tgt_ref, t_ref, out_ref, *,
                             num_classes, no_object_w, num_valid_gt,
                             inv_weight_sum, inv_num_gt, cls_w, l1_w, iou_w):
    # cls_ref     : [1, BQp, Cp]  this level's logits (class dim padded with -1e9)
    # matched_ref : [1, 4, Np]    this level's matched predicted boxes, lane-dense
    # tgt_ref     : [4, Np]       matched gt boxes, lane-dense
    # t_ref       : [BQp, 1]      int32 per-query target class (-1 on padded rows)
    # out_ref     : [1, 1, 128]   packed lane-dense scalars (cls, l1, iou)

    # ---- weighted cross-entropy over all queries of this level --------------
    logits = cls_ref[0]                                            # [BQp, Cp]
    t = t_ref[...]                                                 # [BQp, 1] int32
    m = jnp.max(logits, axis=-1, keepdims=True)
    lse = m + jnp.log(jnp.sum(jnp.exp(logits - m), axis=-1, keepdims=True))
    lane_c = jax.lax.broadcasted_iota(jnp.int32, logits.shape, 1)
    onehot = (lane_c == t).astype(jnp.float32)                     # built in-kernel
    gathered = jnp.sum(logits * onehot, axis=-1, keepdims=True)
    nll = lse - gathered                                           # [BQp, 1]
    w = jnp.where(t == num_classes, jnp.float32(no_object_w),
                  jnp.where(t >= 0, jnp.float32(1.0), jnp.float32(0.0)))
    cls_loss = jnp.sum(w * nll, keepdims=True) * inv_weight_sum    # [1, 1]

    # ---- matched-box L1 + GIoU loss (lane-dense [4, Np]) ---------------------
    pred = jnp.clip(matched_ref[0], 0.0001, 1.0 - 0.0001)          # [4, Np]
    tgt = tgt_ref[...]                                             # [4, Np]
    lane_n = jax.lax.broadcasted_iota(jnp.int32, (1, pred.shape[1]), 1)
    valid = (lane_n < num_valid_gt).astype(jnp.float32)            # [1, Np]

    l1_loss = jnp.sum(jnp.abs(pred - tgt) * valid, keepdims=True) * inv_num_gt

    pcx, pcy, pw, ph = pred[0:1, :], pred[1:2, :], pred[2:3, :], pred[3:4, :]
    tcx, tcy, tw, th = tgt[0:1, :], tgt[1:2, :], tgt[2:3, :], tgt[3:4, :]
    giou = _giou(pcx - 0.5 * pw, pcy - 0.5 * ph, pcx + 0.5 * pw, pcy + 0.5 * ph,
                 tcx - 0.5 * tw, tcy - 0.5 * th, tcx + 0.5 * tw, tcy + 0.5 * th,
                 approx=False)                                     # [1, Np]
    iou_loss = jnp.sum((1.0 - giou) * valid, keepdims=True) * inv_num_gt

    # Pack the three (already loss-weighted) scalars into one lane-dense row.
    lane = jax.lax.broadcasted_iota(jnp.int32, (1, _OUT_LANES), 1)
    row = (jnp.where(lane == 0, cls_w * cls_loss, 0.0) +
           jnp.where(lane == 1, l1_w * l1_loss, 0.0) +
           jnp.where(lane == 2, iou_w * iou_loss, 0.0))
    out_ref[0] = row


# ----------------------------------------------------------------------------
# Pallas call wrappers
# ----------------------------------------------------------------------------
def cost_matrix_pallas(cls_pad, reg_pad, gt_t_pad, onehot_g, *, tile_bq,
                       cls_w, box_w, giou_w):
    bq_pad, c_pad = cls_pad.shape
    g_pad = gt_t_pad.shape[1]
    n_tiles = bq_pad // tile_bq
    kernel = functools.partial(_cost_matrix_kernel,
                               cls_cost_w=float(cls_w),
                               box_cost_w=float(box_w),
                               giou_cost_w=float(giou_w))
    block_bytes = 4 * (tile_bq * c_pad + tile_bq * 4 + 4 * g_pad
                       + c_pad * g_pad + tile_bq * g_pad)
    vmem_limit = int(min(max(2 * block_bytes + (4 << 20), 32 << 20), 64 << 20))
    return pl.pallas_call(
        kernel,
        out_shape=jax.ShapeDtypeStruct((bq_pad, g_pad), jnp.float32),
        grid=(n_tiles,),
        in_specs=[pl.BlockSpec((tile_bq, c_pad), lambda i: (i, 0)),
                  pl.BlockSpec((tile_bq, 4), lambda i: (i, 0)),
                  pl.BlockSpec((4, g_pad), lambda i: (0, 0)),
                  pl.BlockSpec((c_pad, g_pad), lambda i: (0, 0))],
        out_specs=pl.BlockSpec((tile_bq, g_pad), lambda i: (i, 0)),
        compiler_params=pltpu.CompilerParams(
            dimension_semantics=("parallel",),     # row tiles shard across TCs
            vmem_limit_bytes=vmem_limit),
    )(cls_pad, reg_pad, gt_t_pad, onehot_g)


def fused_level_losses_pallas(cls_pad, matched_t, tgt_t_pad, targets, *,
                              num_classes, no_object_w, num_valid_gt,
                              inv_weight_sum, inv_num_gt, cls_w, l1_w, iou_w):
    num_levels, bq_pad, c_pad = cls_pad.shape
    n_pad = matched_t.shape[2]
    kernel = functools.partial(_fused_level_loss_kernel,
                               num_classes=int(num_classes),
                               no_object_w=float(no_object_w),
                               num_valid_gt=int(num_valid_gt),
                               inv_weight_sum=float(inv_weight_sum),
                               inv_num_gt=float(inv_num_gt),
                               cls_w=float(cls_w), l1_w=float(l1_w),
                               iou_w=float(iou_w))
    block_bytes = 4 * (bq_pad * c_pad + 4 * n_pad + 4 * n_pad + bq_pad + _OUT_LANES)
    vmem_limit = int(min(max(2 * block_bytes + (4 << 20), 32 << 20), 64 << 20))
    return pl.pallas_call(
        kernel,
        out_shape=jax.ShapeDtypeStruct((num_levels, 1, _OUT_LANES), jnp.float32),
        grid=(num_levels,),
        in_specs=[pl.BlockSpec((1, bq_pad, c_pad), lambda l: (l, 0, 0)),
                  pl.BlockSpec((1, 4, n_pad), lambda l: (l, 0, 0)),
                  pl.BlockSpec((4, n_pad), lambda l: (0, 0)),
                  pl.BlockSpec((bq_pad, 1), lambda l: (0, 0))],
        out_specs=pl.BlockSpec((1, 1, _OUT_LANES), lambda l: (l, 0, 0)),
        compiler_params=pltpu.CompilerParams(
            dimension_semantics=("parallel",),     # levels shard across TCs
            vmem_limit_bytes=vmem_limit),
    )(cls_pad, matched_t, tgt_t_pad, targets)


# ----------------------------------------------------------------------------
# Host-side Hungarian matching.  Uses scipy's O(n^3) linear_sum_assignment when
# available; otherwise an exact numpy Jonker-Volgenant shortest-augmenting-path
# implementation.  (This is data-dependent sequential host control flow; the
# original PyTorch code also runs it on CPU via scipy.)
# ----------------------------------------------------------------------------
def _hungarian_rect(cost):
    """Exact rectangular assignment; requires rows <= cols.  Returns
    (row_ind, col_ind) with every row assigned."""
    n, m = cost.shape
    u = np.zeros(n + 1, dtype=np.float64)
    v = np.zeros(m + 1, dtype=np.float64)
    p = np.zeros(m + 1, dtype=np.int64)        # p[j]: 1-indexed row matched to col j
    way = np.zeros(m + 1, dtype=np.int64)
    for i in range(1, n + 1):
        p[0] = i
        j0 = 0
        minv = np.full(m + 1, np.inf, dtype=np.float64)
        used = np.zeros(m + 1, dtype=bool)
        while True:
            used[j0] = True
            i0 = p[j0]
            cur = cost[i0 - 1, :] - u[i0] - v[1:]
            free = ~used[1:]
            improve = free & (cur < minv[1:])
            if improve.any():
                idx = np.where(improve)[0]
                minv[idx + 1] = cur[idx]
                way[idx + 1] = j0
            cand = np.where(free, minv[1:], np.inf)
            j1 = int(np.argmin(cand)) + 1
            delta = cand[j1 - 1]
            used_idx = np.where(used)[0]
            u[p[used_idx]] += delta
            v[used_idx] -= delta
            minv[np.where(~used)[0]] -= delta
            j0 = j1
            if p[j0] == 0:
                break
        while True:
            j1 = way[j0]
            p[j0] = p[j1]
            j0 = j1
            if j0 == 0:
                break
    row_ind, col_ind = [], []
    for j in range(1, m + 1):
        if p[j] != 0:
            row_ind.append(p[j] - 1)
            col_ind.append(j - 1)
    row_ind = np.asarray(row_ind, dtype=np.int64)
    col_ind = np.asarray(col_ind, dtype=np.int64)
    order = np.argsort(row_ind)
    return row_ind[order], col_ind[order]


def _linear_sum_assignment(cost):
    cost = np.asarray(cost, dtype=np.float64)
    if np.isnan(cost).any():
        cost = np.where(np.isnan(cost), 1e5, cost)   # mirrors the reference handling
    q, g = cost.shape
    if q == 0 or g == 0:
        return np.zeros((0,), np.int64), np.zeros((0,), np.int64)
    if _scipy_lsa is not None:
        rows, cols = _scipy_lsa(cost)
        return np.asarray(rows, dtype=np.int64), np.asarray(cols, dtype=np.int64)
    if q >= g:
        gt_rows, q_cols = _hungarian_rect(cost.T)    # rows = gts, cols = queries
        order = np.argsort(q_cols)
        return q_cols[order], gt_rows[order]
    return _hungarian_rect(cost)


# ----------------------------------------------------------------------------
# DETRLoss (JAX / Pallas)
# ----------------------------------------------------------------------------
class DETRLoss:

    def __init__(self, cls_match_cost=1.0, box_match_cost=5.0, giou_match_cost=2.0,
                 cls_loss_weight=1.0, box_l1_loss_weight=5.0, iou_loss_weight=2.0,
                 no_object_cls_weight=0.1, num_classes=80):
        self.cls_match_cost = cls_match_cost
        self.box_match_cost = box_match_cost
        self.giou_match_cost = giou_match_cost
        self.cls_loss_weight = cls_loss_weight
        self.box_l1_loss_weight = box_l1_loss_weight
        self.iou_loss_weight = iou_loss_weight
        self.no_object_cls_weight = no_object_cls_weight
        self.num_classes = num_classes
        assert (self.cls_match_cost != 0 or self.box_match_cost != 0
                or self.giou_match_cost != 0), 'all costs cant be 0'

    def __call__(self, preds, annotations):
        cls_preds, reg_preds = preds
        num_levels, batch_size, query_nums, c1 = cls_preds.shape
        assert c1 == self.num_classes + 1
        bq = batch_size * query_nums

        cls_flat = cls_preds.reshape(num_levels, bq, c1)
        reg_flat = reg_preds.reshape(num_levels, bq, 4)   # clamp is done inside kernels

        # --------- lane-dense padding of the class and query dims ------------
        c_pad = _round_up(c1, 128)
        bq8 = _round_up(bq, 8)
        tile_bq = bq8 if bq8 <= 1024 else 512
        bq_pad = _round_up(bq8, tile_bq)
        # class padding -1e9 keeps softmax / LSE unaffected; row padding is masked out.
        cls_pad = jnp.pad(cls_flat, ((0, 0), (0, 0), (0, c_pad - c1)),
                          constant_values=-1e9)
        cls_pad = jnp.pad(cls_pad, ((0, 0), (0, bq_pad - bq), (0, 0)))
        reg_pad = jnp.pad(reg_flat, ((0, 0), (0, bq_pad - bq), (0, 0)),
                          constant_values=0.5)

        # --------- filter valid gt boxes (host side, like the torch code) ----
        ann_np = np.asarray(annotations)
        filter_targets = [ann_np[b][ann_np[b][:, 4] >= 0] for b in range(batch_size)]
        counts = [int(t.shape[0]) for t in filter_targets]
        total_gt = int(sum(counts))
        # TODO(synk): total_gt == 0 (no gt in the whole batch) divides by zero in the
        # reference implementation as well; it is out of scope here.
        gt_all = np.concatenate(filter_targets, axis=0)
        gt_boxes = gt_all[:, :4].astype(np.float32)        # [G, 4]
        gt_labels = gt_all[:, 4].astype(np.int32)          # [G]

        # pad gt dim up to a multiple of 128 -> lane-dense cost-matrix output
        g_pad = max(128, _round_up(total_gt, 128))
        gt_t_pad = np.full((4, g_pad), 0.5, dtype=np.float32)
        gt_t_pad[:, :total_gt] = gt_boxes.T
        onehot_g = np.zeros((c_pad, g_pad), dtype=np.float32)   # one-hot per gt column
        onehot_g[gt_labels, np.arange(total_gt)] = 1.0

        # --------- cost matrix (Pallas) on the LAST decoder level ------------
        cost = cost_matrix_pallas(
            cls_pad[-1], reg_pad[-1], jnp.asarray(gt_t_pad), jnp.asarray(onehot_g),
            tile_bq=tile_bq, cls_w=self.cls_match_cost,
            box_w=self.box_match_cost, giou_w=self.giou_match_cost)
        # slice to valid rows/cols on DEVICE before the host transfer
        cost_np = np.asarray(jax.device_get(cost[:bq, :total_gt]))
        cost_np = cost_np.reshape(batch_size, query_nums, total_gt)

        # --------- Hungarian matching per image (host) -----------------------
        indices = []
        off = 0
        for b in range(batch_size):
            c = counts[b]
            rows, cols = _linear_sum_assignment(cost_np[b][:, off:off + c])
            indices.append((rows, cols))
            off += c

        batch_idx = np.concatenate(
            [np.full_like(rows, b) for b, (rows, _) in enumerate(indices)])
        src_idx = np.concatenate([rows for rows, _ in indices])
        target_labels = np.concatenate(
            [filter_targets[b][:, 4].astype(np.int32)[cols]
             for b, (_, cols) in enumerate(indices)])
        target_boxes = np.concatenate(
            [filter_targets[b][:, :4][cols] for b, (_, cols) in enumerate(indices)],
            axis=0).astype(np.float32)                     # [N, 4]
        flat_idx = (batch_idx * query_nums + src_idx).astype(np.int32)   # [N]

        n_match = flat_idx.shape[0]                        # == total_gt
        n_pad = max(128, _round_up(n_match, 128))

        # per-query int32 targets (one-hot / CE weight are built in-kernel);
        # padded query rows get -1 -> weight 0.
        targets_cls = np.full((bq_pad, 1), -1, dtype=np.int32)
        targets_cls[:bq, 0] = self.num_classes
        targets_cls[flat_idx, 0] = target_labels
        weight_sum = float(n_match) + float(bq - n_match) * float(self.no_object_cls_weight)
        inv_weight_sum = 1.0 / weight_sum
        inv_num_gt = 1.0 / float(total_gt)

        # matched predicted boxes for ALL levels, lane-dense [L, 4, N_pad]
        matched = reg_flat[:, jnp.asarray(flat_idx), :]                # [L, N, 4]
        matched_t = jnp.transpose(matched, (0, 2, 1))                  # [L, 4, N]
        matched_t = jnp.pad(matched_t, ((0, 0), (0, 0), (0, n_pad - n_match)),
                            constant_values=0.5)
        tgt_t_pad = np.full((4, n_pad), 0.5, dtype=np.float32)
        tgt_t_pad[:, :n_match] = target_boxes.T

        # --------- one fused Pallas call for every level's losses ------------
        packed = fused_level_losses_pallas(
            cls_pad, matched_t, jnp.asarray(tgt_t_pad), jnp.asarray(targets_cls),
            num_classes=self.num_classes, no_object_w=self.no_object_cls_weight,
            num_valid_gt=n_match, inv_weight_sum=inv_weight_sum,
            inv_num_gt=inv_num_gt, cls_w=self.cls_loss_weight,
            l1_w=self.box_l1_loss_weight, iou_w=self.iou_loss_weight)  # [L, 1, 128]

        loss_dict = {}
        for idx in range(num_levels):
            loss_dict[f'layer_{idx}_cls_loss'] = packed[idx, 0, 0]
            loss_dict[f'layer_{idx}_box_l1_loss'] = packed[idx, 0, 1]
            loss_dict[f'layer_{idx}_box_iou_loss'] = packed[idx, 0, 2]
        return loss_dict


# ----------------------------------------------------------------------------
if __name__ == "__main__":
    key = jax.random.PRNGKey(0)
    num_levels, batch_size, query_nums, num_classes = 2, 2, 8, 20
    c1 = num_classes + 1

    k1, k2 = jax.random.split(key)
    cls_preds = jax.random.normal(k1, (num_levels, batch_size, query_nums, c1),
                                  dtype=jnp.float32)
    reg_preds = jax.nn.sigmoid(
        jax.random.normal(k2, (num_levels, batch_size, query_nums, 4),
                          dtype=jnp.float32))

    # annotations: [batch, max_annots, 5] with (cx, cy, w, h, label); label -1 == pad
    max_annots = 4
    ann = np.full((batch_size, max_annots, 5), -1.0, dtype=np.float32)
    ann[0, 0] = [0.50, 0.50, 0.40, 0.30, 3]
    ann[0, 1] = [0.20, 0.30, 0.20, 0.20, 7]
    ann[0, 2] = [0.70, 0.60, 0.30, 0.40, 1]
    ann[1, 0] = [0.40, 0.50, 0.50, 0.50, 5]
    ann[1, 1] = [0.80, 0.20, 0.20, 0.30, 12]
    annotations = jnp.asarray(ann)

    loss_fn = DETRLoss(num_classes=num_classes)
    loss_dict = loss_fn((cls_preds, reg_preds), annotations)
    jax.block_until_ready(list(loss_dict.values()))
    print("KERNEL_OK")
</pallas_src>

<mosaic_0001>
module attributes {stable_mosaic.version = 11 : i64} {
  func.func @_cost_matrix_kernel(%arg0: i32, %arg1: memref<16x128xf32, #tpu.memory_space<vmem>>, %arg2: memref<16x4xf32, #tpu.memory_space<vmem>>, %arg3: memref<4x128xf32, #tpu.memory_space<vmem>>, %arg4: memref<128x128xf32, #tpu.memory_space<vmem>>, %arg5: memref<16x128xf32, #tpu.memory_space<vmem>>) attributes {dimension_semantics = [#tpu.dimension_semantics<parallel>], iteration_bounds = array<i64: 1>, scalar_prefetch = 0 : i64, scratch_operands = 0 : i64, tpu.core_type = #tpu.core_type<tc>, window_params = [{transform_indices = @transform_0, window_bounds = array<i64: 16, 128>}, {transform_indices = @transform_1, window_bounds = array<i64: 16, 4>}, {pipeline_mode = #tpu.pipeline_mode<synchronous>, transform_indices = @transform_2, window_bounds = array<i64: 4, 128>}, {pipeline_mode = #tpu.pipeline_mode<synchronous>, transform_indices = @transform_3, window_bounds = array<i64: 128, 128>}, {transform_indices = @transform_4, window_bounds = array<i64: 16, 128>}]} {
    %c0 = arith.constant 0 : index
    %c0_0 = arith.constant 0 : index
    %0 = vector.load %arg1[%c0, %c0_0] : memref<16x128xf32, #tpu.memory_space<vmem>>, vector<16x128xf32>
    %cst = arith.constant dense<0xFF800000> : vector<16xf32>
    %1 = vector.multi_reduction <maximumf>, %0, %cst [1] : vector<16x128xf32> to vector<16xf32>
    %2 = vector.shape_cast %1 : vector<16xf32> to vector<16x1xf32>
    %3 = vector.broadcast %2 : vector<16x1xf32> to vector<16x128xf32>
    %4 = arith.subf %0, %3 : vector<16x128xf32>
    %5 = math.exp %4 : vector<16x128xf32>
    %cst_1 = arith.constant dense<0.000000e+00> : vector<16xf32>
    %6 = vector.multi_reduction <add>, %5, %cst_1 [1] : vector<16x128xf32> to vector<16xf32>
    %7 = vector.shape_cast %6 : vector<16xf32> to vector<16x1xf32>
    %8 = tpu.reciprocal %7 {approx = true} : vector<16x1xf32> -> vector<16x1xf32>
    %9 = vector.broadcast %8 : vector<16x1xf32> to vector<16x128xf32>
    %10 = arith.mulf %5, %9 : vector<16x128xf32>
    %cst_2 = arith.constant 9.99999974E-5 : f32
    %cst_3 = arith.constant 0.999899983 : f32
    %11 = vector.broadcast %cst_2 : f32 to vector<16x128xf32>
    %12 = arith.maximumf %11, %10 : vector<16x128xf32>
    %13 = vector.broadcast %cst_3 : f32 to vector<16x128xf32>
    %14 = arith.minimumf %13, %12 : vector<16x128xf32>
    %c0_4 = arith.constant 0 : index
    %c0_5 = arith.constant 0 : index
    %15 = vector.load %arg4[%c0_4, %c0_5] : memref<128x128xf32, #tpu.memory_space<vmem>>, vector<128x128xf32>
    %cst_6 = arith.constant dense<0.000000e+00> : vector<16x128xf32>
    %16 = tpu.matmul %14, %15, %cst_6 {dimension_numbers = #tpu.dot_dimension_numbers<[1], [0], [0], [1], [0, 0, 1, 1], [], []>} : vector<16x128xf32>, vector<128x128xf32>, vector<16x128xf32> -> vector<16x128xf32>
    %cst_7 = arith.constant 0.000000e+00 : f32
    %17 = vector.broadcast %cst_7 : f32 to vector<16x128xf32>
    %18 = arith.subf %17, %16 : vector<16x128xf32>
    %c0_8 = arith.constant 0 : index
    %c0_9 = arith.constant 0 : index
    %19 = vector.load %arg2[%c0_8, %c0_9] : memref<16x4xf32, #tpu.memory_space<vmem>>, vector<16x4xf32>
    %cst_10 = arith.constant 9.99999974E-5 : f32
    %cst_11 = arith.constant 0.999899983 : f32
    %20 = vector.broadcast %cst_10 : f32 to vector<16x4xf32>
    %21 = arith.maximumf %20, %19 : vector<16x4xf32>
    %22 = vector.broadcast %cst_11 : f32 to vector<16x4xf32>
    %23 = arith.minimumf %22, %21 : vector<16x4xf32>
    %c0_12 = arith.constant 0 : index
    %c0_13 = arith.constant 0 : index
    %24 = vector.load %arg3[%c0_12, %c0_13] : memref<4x128xf32, #tpu.memory_space<vmem>>, vector<4x128xf32>
    %25 = vector.extract_strided_slice %23 {offsets = [0, 0], sizes = [16, 1], strides = [1, 1]} : vector<16x4xf32> to vector<16x1xf32>
    %26 = vector.extract_strided_slice %24 {offsets = [0, 0], sizes = [1, 128], strides = [1, 1]} : vector<4x128xf32> to vector<1x128xf32>
    %27 = vector.broadcast %25 : vector<16x1xf32> to vector<16x128xf32>
    %28 = vector.broadcast %26 : vector<1x128xf32> to vector<16x128xf32>
    %29 = arith.subf %27, %28 : vector<16x128xf32>
    %30 = math.absf %29 : vector<16x128xf32>
    %31 = vector.extract_strided_slice %23 {offsets = [0, 1], sizes = [16, 1], strides = [1, 1]} : vector<16x4xf32> to vector<16x1xf32>
    %32 = vector.extract_strided_slice %24 {offsets = [1, 0], sizes = [1, 128], strides = [1, 1]} : vector<4x128xf32> to vector<1x128xf32>
    %33 = vector.broadcast %31 : vector<16x1xf32> to vector<16x128xf32>
    %34 = vector.broadcast %32 : vector<1x128xf32> to vector<16x128xf32>
    %35 = arith.subf %33, %34 : vector<16x128xf32>
    %36 = math.absf %35 : vector<16x128xf32>
    %37 = arith.addf %30, %36 : vector<16x128xf32>
    %38 = vector.extract_strided_slice %23 {offsets = [0, 2], sizes = [16, 1], strides = [1, 1]} : vector<16x4xf32> to vector<16x1xf32>
    %39 = vector.extract_strided_slice %24 {offsets = [2, 0], sizes = [1, 128], strides = [1, 1]} : vector<4x128xf32> to vector<1x128xf32>
    %40 = vector.broadcast %38 : vector<16x1xf32> to vector<16x128xf32>
    %41 = vector.broadcast %39 : vector<1x128xf32> to vector<16x128xf32>
    %42 = arith.subf %40, %41 : vector<16x128xf32>
    %43 = math.absf %42 : vector<16x128xf32>
    %44 = arith.addf %37, %43 : vector<16x128xf32>
    %45 = vector.extract_strided_slice %23 {offsets = [0, 3], sizes = [16, 1], strides = [1, 1]} : vector<16x4xf32> to vector<16x1xf32>
    %46 = vector.extract_strided_slice %24 {offsets = [3, 0], sizes = [1, 128], strides = [1, 1]} : vector<4x128xf32> to vector<1x128xf32>
    %47 = vector.broadcast %45 : vector<16x1xf32> to vector<16x128xf32>
    %48 = vector.broadcast %46 : vector<1x128xf32> to vector<16x128xf32>
    %49 = arith.subf %47, %48 : vector<16x128xf32>
    %50 = math.absf %49 : vector<16x128xf32>
    %51 = arith.addf %44, %50 : vector<16x128xf32>
    %52 = vector.extract_strided_slice %23 {offsets = [0, 0], sizes = [16, 1], strides = [1, 1]} : vector<16x4xf32> to vector<16x1xf32>
    %53 = vector.extract_strided_slice %23 {offsets = [0, 1], sizes = [16, 1], strides = [1, 1]} : vector<16x4xf32> to vector<16x1xf32>
    %54 = vector.extract_strided_slice %23 {offsets = [0, 2], sizes = [16, 1], strides = [1, 1]} : vector<16x4xf32> to vector<16x1xf32>
    %55 = vector.extract_strided_slice %23 {offsets = [0, 3], sizes = [16, 1], strides = [1, 1]} : vector<16x4xf32> to vector<16x1xf32>
    %56 = vector.extract_strided_slice %24 {offsets = [0, 0], sizes = [1, 128], strides = [1, 1]} : vector<4x128xf32> to vector<1x128xf32>
    %57 = vector.extract_strided_slice %24 {offsets = [1, 0], sizes = [1, 128], strides = [1, 1]} : vector<4x128xf32> to vector<1x128xf32>
    %58 = vector.extract_strided_slice %24 {offsets = [2, 0], sizes = [1, 128], strides = [1, 1]} : vector<4x128xf32> to vector<1x128xf32>
    %59 = vector.extract_strided_slice %24 {offsets = [3, 0], sizes = [1, 128], strides = [1, 1]} : vector<4x128xf32> to vector<1x128xf32>
    %cst_14 = arith.constant 5.000000e-01 : f32
    %60 = vector.broadcast %cst_14 : f32 to vector<16x1xf32>
    %61 = arith.mulf %60, %54 : vector<16x1xf32>
    %62 = arith.subf %52, %61 : vector<16x1xf32>
    %cst_15 = arith.constant 5.000000e-01 : f32
    %63 = vector.broadcast %cst_15 : f32 to vector<16x1xf32>
    %64 = arith.mulf %63, %55 : vector<16x1xf32>
    %65 = arith.subf %53, %64 : vector<16x1xf32>
    %cst_16 = arith.constant 5.000000e-01 : f32
    %66 = vector.broadcast %cst_16 : f32 to vector<16x1xf32>
    %67 = arith.mulf %66, %54 : vector<16x1xf32>
    %68 = arith.addf %52, %67 : vector<16x1xf32>
    %cst_17 = arith.constant 5.000000e-01 : f32
    %69 = vector.broadcast %cst_17 : f32 to vector<16x1xf32>
    %70 = arith.mulf %69, %55 : vector<16x1xf32>
    %71 = arith.addf %53, %70 : vector<16x1xf32>
    %cst_18 = arith.constant 5.000000e-01 : f32
    %72 = vector.broadcast %cst_18 : f32 to vector<1x128xf32>
    %73 = arith.mulf %72, %58 : vector<1x128xf32>
    %74 = arith.subf %56, %73 : vector<1x128xf32>
    %cst_19 = arith.constant 5.000000e-01 : f32
    %75 = vector.broadcast %cst_19 : f32 to vector<1x128xf32>
    %76 = arith.mulf %75, %59 : vector<1x128xf32>
    %77 = arith.subf %57, %76 : vector<1x128xf32>
    %cst_20 = arith.constant 5.000000e-01 : f32
    %78 = vector.broadcast %cst_20 : f32 to vector<1x128xf32>
    %79 = arith.mulf %78, %58 : vector<1x128xf32>
    %80 = arith.addf %56, %79 : vector<1x128xf32>
    %cst_21 = arith.constant 5.000000e-01 : f32
    %81 = vector.broadcast %cst_21 : f32 to vector<1x128xf32>
    %82 = arith.mulf %81, %59 : vector<1x128xf32>
    %83 = arith.addf %57, %82 : vector<1x128xf32>
    %84 = arith.subf %68, %62 : vector<16x1xf32>
    %85 = arith.subf %71, %65 : vector<16x1xf32>
    %86 = arith.mulf %84, %85 : vector<16x1xf32>
    %cst_22 = arith.constant 0.000000e+00 : f32
    %87 = vector.broadcast %cst_22 : f32 to vector<16x1xf32>
    %88 = arith.maximumf %86, %87 : vector<16x1xf32>
    %89 = arith.subf %80, %74 : vector<1x128xf32>
    %90 = arith.subf %83, %77 : vector<1x128xf32>
    %91 = arith.mulf %89, %90 : vector<1x128xf32>
    %cst_23 = arith.constant 0.000000e+00 : f32
    %92 = vector.broadcast %cst_23 : f32 to vector<1x128xf32>
    %93 = arith.maximumf %91, %92 : vector<1x128xf32>
    %94 = vector.broadcast %68 : vector<16x1xf32> to vector<16x128xf32>
    %95 = vector.broadcast %80 : vector<1x128xf32> to vector<16x128xf32>
    %96 = arith.minimumf %94, %95 : vector<16x128xf32>
    %97 = vector.broadcast %62 : vector<16x1xf32> to vector<16x128xf32>
    %98 = vector.broadcast %74 : vector<1x128xf32> to vector<16x128xf32>
    %99 = arith.maximumf %97, %98 : vector<16x128xf32>
    %100 = arith.subf %96, %99 : vector<16x128xf32>
    %cst_24 = arith.constant 0.000000e+00 : f32
    %101 = vector.broadcast %cst_24 : f32 to vector<16x128xf32>
    %102 = arith.maximumf %100, %101 : vector<16x128xf32>
    %103 = vector.broadcast %71 : vector<16x1xf32> to vector<16x128xf32>
    %104 = vector.broadcast %83 : vector<1x128xf32> to vector<16x128xf32>
    %105 = arith.minimumf %103, %104 : vector<16x128xf32>
    %106 = vector.broadcast %65 : vector<16x1xf32> to vector<16x128xf32>
    %107 = vector.broadcast %77 : vector<1x128xf32> to vector<16x128xf32>
    %108 = arith.maximumf %106, %107 : vector<16x128xf32>
    %109 = arith.subf %105, %108 : vector<16x128xf32>
    %cst_25 = arith.constant 0.000000e+00 : f32
    %110 = vector.broadcast %cst_25 : f32 to vector<16x128xf32>
    %111 = arith.maximumf %109, %110 : vector<16x128xf32>
    %112 = arith.mulf %102, %111 : vector<16x128xf32>
    %cst_26 = arith.constant 0.000000e+00 : f32
    %113 = vector.broadcast %cst_26 : f32 to vector<16x128xf32>
    %114 = arith.maximumf %112, %113 : vector<16x128xf32>
    %115 = vector.broadcast %88 : vector<16x1xf32> to vector<16x128xf32>
    %116 = vector.broadcast %93 : vector<1x128xf32> to vector<16x128xf32>
    %117 = arith.addf %115, %116 : vector<16x128xf32>
    %118 = arith.subf %117, %114 : vector<16x128xf32>
    %cst_27 = arith.constant 9.99999974E-5 : f32
    %119 = vector.broadcast %cst_27 : f32 to vector<16x128xf32>
    %120 = arith.maximumf %118, %119 : vector<16x128xf32>
    %121 = vector.broadcast %68 : vector<16x1xf32> to vector<16x128xf32>
    %122 = vector.broadcast %80 : vector<1x128xf32> to vector<16x128xf32>
    %123 = arith.maximumf %121, %122 : vector<16x128xf32>
    %124 = vector.broadcast %62 : vector<16x1xf32> to vector<16x128xf32>
    %125 = vector.broadcast %74 : vector<1x128xf32> to vector<16x128xf32>
    %126 = arith.minimumf %124, %125 : vector<16x128xf32>
    %127 = arith.subf %123, %126 : vector<16x128xf32>
    %cst_28 = arith.constant 0.000000e+00 : f32
    %128 = vector.broadcast %cst_28 : f32 to vector<16x128xf32>
    %129 = arith.maximumf %127, %128 : vector<16x128xf32>
    %130 = vector.broadcast %71 : vector<16x1xf32> to vector<16x128xf32>
    %131 = vector.broadcast %83 : vector<1x128xf32> to vector<16x128xf32>
    %132 = arith.maximumf %130, %131 : vector<16x128xf32>
    %133 = vector.broadcast %65 : vector<16x1xf32> to vector<16x128xf32>
    %134 = vector.broadcast %77 : vector<1x128xf32> to vector<16x128xf32>
    %135 = arith.minimumf %133, %134 : vector<16x128xf32>
    %136 = arith.subf %132, %135 : vector<16x128xf32>
    %cst_29 = arith.constant 0.000000e+00 : f32
    %137 = vector.broadcast %cst_29 : f32 to vector<16x128xf32>
    %138 = arith.maximumf %136, %137 : vector<16x128xf32>
    %139 = arith.mulf %129, %138 : vector<16x128xf32>
    %cst_30 = arith.constant 9.99999974E-5 : f32
    %140 = vector.broadcast %cst_30 : f32 to vector<16x128xf32>
    %141 = arith.maximumf %139, %140 : vector<16x128xf32>
    %142 = tpu.reciprocal %120 {approx = true} : vector<16x128xf32> -> vector<16x128xf32>
    %143 = arith.mulf %114, %142 : vector<16x128xf32>
    %144 = arith.subf %141, %120 : vector<16x128xf32>
    %145 = tpu.reciprocal %141 {approx = true} : vector<16x128xf32> -> vector<16x128xf32>
    %146 = arith.mulf %144, %145 : vector<16x128xf32>
    %147 = arith.subf %143, %146 : vector<16x128xf32>
    %cst_31 = arith.constant 1.000000e+00 : f32
    %148 = vector.broadcast %cst_31 : f32 to vector<16x128xf32>
    %149 = arith.mulf %148, %18 : vector<16x128xf32>
    %cst_32 = arith.constant 5.000000e+00 : f32
    %150 = vector.broadcast %cst_32 : f32 to vector<16x128xf32>
    %151 = arith.mulf %150, %51 : vector<16x128xf32>
    %152 = arith.addf %149, %151 : vector<16x128xf32>
    %cst_33 = arith.constant 0.000000e+00 : f32
    %153 = vector.broadcast %cst_33 : f32 to vector<16x128xf32>
    %154 = arith.subf %153, %147 : vector<16x128xf32>
    %cst_34 = arith.constant 2.000000e+00 : f32
    %155 = vector.broadcast %cst_34 : f32 to vector<16x128xf32>
    %156 = arith.mulf %155, %154 : vector<16x128xf32>
    %157 = arith.addf %152, %156 : vector<16x128xf32>
    %c0_35 = arith.constant 0 : index
    %c0_36 = arith.constant 0 : index
    %158 = vector.load %arg5[%c0_35, %c0_36] : memref<16x128xf32, #tpu.memory_space<vmem>>, vector<16x128xf32>
    tpu.vector_store %arg5[%c0_35, %c0_36], %157 {strides = array<i32>} : memref<16x128xf32, #tpu.memory_space<vmem>>, vector<16x128xf32>,
    return
  }
  func.func @transform_0(%arg0: i32) -> (i32, i32) {
    %c0_i32 = arith.constant 0 : i32
    %c0_i32_0 = arith.constant 0 : i32
    return %arg0, %c0_i32 : i32, i32
  }
  func.func @transform_1(%arg0: i32) -> (i32, i32) {
    %c0_i32 = arith.constant 0 : i32
    %c0_i32_0 = arith.constant 0 : i32
    return %arg0, %c0_i32 : i32, i32
  }
  func.func @transform_2(%arg0: i32) -> (i32, i32) {
    %c0_i32 = arith.constant 0 : i32
    %c0_i32_0 = arith.constant 0 : i32
    %c0_i32_1 = arith.constant 0 : i32
    return %c0_i32, %c0_i32_0 : i32, i32
  }
  func.func @transform_3(%arg0: i32) -> (i32, i32) {
    %c0_i32 = arith.constant 0 : i32
    %c0_i32_0 = arith.constant 0 : i32
    %c0_i32_1 = arith.constant 0 : i32
    return %c0_i32, %c0_i32_0 : i32, i32
  }
  func.func @transform_4(%arg0: i32) -> (i32, i32) {
    %c0_i32 = arith.constant 0 : i32
    %c0_i32_0 = arith.constant 0 : i32
    return %arg0, %c0_i32 : i32, i32
  }
}

</mosaic_0001>

<bundles_post_ra>
// kernel: tpu_custom_call.1
= control target key start
LH: loop header
LB: loop body
LE: loop exit
PB: predicated region body
PF: predicated region fallthrough
CT: control target
= control target key end

     0   :  { %9 = vsyncpa [#allocation3], 0  ;;  %s583_s0 = inlined_call_operand.vmem [shape: f32[16,128], index: 0, kind: input, shape index: {}]   ;;  %s584_s1 = inlined_call_operand.vmem [shape: f32[16,4], index: 1, kind: input, shape index: {}]   ;;  %s585_s2 = inlined_call_operand.vmem [shape: f32[4,128], index: 2, kind: input, shape index: {}]   ;;  %s586_s3 = inlined_call_operand.hbm [shape: f32[128,128], index: 3, kind: input, shape index: {}]   ;;  %s587_s4 = inlined_call_operand.hbm [shape: f32[16,128], index: 4, kind: output, shape index: {}]  }
   0x1   :  { %10 = vsyncpa [#allocation4], 0  ;;  %s21_s17 = sshll.u32 %s586_s3, 4  ;;  %s455_s18 = smov [#allocation2]   ;;  %s22_s17 = int_to_ptr.hbm [resolvable:$true] %s21_s17 }
   0x2   :  { %s23_s19 = sshll.u32 %s455_s18, 4  ;;  %s456_s20 = smov 128   ;;  %s24_s19 = int_to_ptr.vmem [resolvable:$true] %s23_s19 }
   0x3   :  { %s457_s21 = smov 8  }
   0x4   :  { %29 = dma.hbm_to_vmem [thread:$0]  %s22_s17, 2048, %s24_s19, [#allocation3], %s456_s20, %s456_s20, %s457_s21  }
   0x5   :  { %451 = dma.done.wait [#allocation3], 2048  }
   0x6   :  { %452 = vsyncadd [#allocation3], 4294965248  ;;  %v34_v0 = vld [vmem:[%s583_s0] sm:$0xff]  ;;  %v100_v3 = vld [vmem:[%s584_s1 + $0x8] sm:$0xff]  ;;  %s458_s29 = smov 126   ;;  %v459_v10 = vmov 0  }
   0x7   :  { %v99_v1 = vld [vmem:[%s584_s1] sm:$0xff]  ;;  %36 = vmax.xlane.f32.xlu0 %v34_v0  ;;  %v102_v5 = vmax.f32 %v100_v3, 0.0001  ;;  %v35_v7 = vld [vmem:[%s583_s0 + $0x8] sm:$0xff]  ;;  %373 = vset.pattern.permute.xlu1 %v459_v10  ;;  %v460_v11 = vmov 1   ;;  %s461_s0 = smov 127  }
   0x8   :  { %v101_v2 = vmax.f32 %v99_v1, 0.0001  ;;  %372 = vset.pattern.permute.xlu0 %v459_v10  ;;  %374 = vset.pattern.permute.xlu2 %v460_v11  ;;  %v462_v27 = vmov 2   ;;  %v463_v29 = vmov 3   ;;  %v73_v30 = vld [vmem:[#allocation2 + $0x78] sm:$0xff]  ;;  %v72_v31 = vld [vmem:[#allocation2 + $0x70] sm:$0xff] }
   0x9   :  { %v508_v8 = vmin.f32 %v102_v5, 0.9999  ;;  %74 = vmatpush.msra.mxu0 %v73_v30  ;;  %346 = vmatpush.msra.mxu1 %v73_v30  ;;  %v71_v32 = vld [vmem:[#allocation2 + $0x68] sm:$0xff]  ;;  %v70_v33 = vld [vmem:[#allocation2 + $0x60] sm:$0xff]  ;;  %v69_v34 = vld [vmem:[#allocation2 + $0x58] sm:$0xff]  ;;  %s333_s8 = sshll.u32 %s587_s4, 4  ;;  %s334_s8 = int_to_ptr.hbm [resolvable:$true] %s333_s8 }
   0xa   :  { %v103_v4 = vmin.f32 %v101_v2, 0.9999  ;;  %v68_v36 = vld [vmem:[#allocation2 + $0x50] sm:$0xff]  ;;  %v67_v37 = vld [vmem:[#allocation2 + $0x48] sm:$0xff]  ;;  %v66_v38 = vld [vmem:[#allocation2 + $0x40] sm:$0xff] }
   0xb   :  { %v167_v9 = vmul.f32 0.5, %v508_v8  ;;  %75 = vmatpush.msra.mxu0 %v72_v31  ;;  %347 = vmatpush.msra.mxu1 %v72_v31  ;;  %v65_v41 = vld [vmem:[#allocation2 + $0x38] sm:$0xff]  ;;  %v64_v45 = vld [vmem:[#allocation2 + $0x30] sm:$0xff]  ;;  %v63_v46 = vld [vmem:[#allocation2 + $0x28] sm:$0xff] }
   0xc   :  { %v166_v6 = vmul.f32 0.5, %v103_v4  ;;  %v62_v47 = vld [vmem:[#allocation2 + $0x20] sm:$0xff]  ;;  %v61_v48 = vld [vmem:[#allocation2 + $0x18] sm:$0xff]  ;;  %v60_v49 = vld [vmem:[#allocation2 + $0x10] sm:$0xff] }
   0xd   :  { %76 = vmatpush.msra.mxu0 %v71_v32  ;;  %348 = vmatpush.msra.mxu1 %v71_v32  ;;  %v59_v50 = vld [vmem:[#allocation2 + $0x8] sm:$0xff]  ;;  %v58_v51 = vld [vmem:[#allocation2] sm:$0xff] }
   0xe   :  { %170 = vrot.lane.b32.xlu2 %v166_v6, %s458_s29  ;;  %v561_v6 = vld [vmem:[%s585_s2] sm:$0xf]  ;;  %s464_s2 = smov [#allocation5]  }
   0xf   :  { %38 = vmax.xlane.f32.xlu0 %v35_v7  ;;  %77 = vmatpush.msra.mxu0 %v70_v33  ;;  %s331_s5 = sshll.u32 %s464_s2, 4  ;;  %s332_s5 = int_to_ptr.vmem [resolvable:$true] %s331_s5 }
  0x10   :  { %349 = vmatpush.msra.mxu1 %v70_v33 }
  0x11   :  { %78 = vmatpush.msra.mxu0 %v69_v34 }
  0x12   :  { %350 = vmatpush.msra.mxu1 %v69_v34 }
  0x13   :  { %79 = vmatpush.msra.mxu0 %v68_v36 }
  0x14   :  { %351 = vmatpush.msra.mxu1 %v68_v36 }
  0x15   :  { %80 = vmatpush.msra.mxu0 %v67_v37 }
  0x16   :  { %172 = vrot.lane.b32.xlu2 %v167_v9, %s458_s29  ;;  %352 = vmatpush.msra.mxu1 %v67_v37 }
  0x17   :  { %81 = vmatpush.msra.mxu0 %v66_v38 }
  0x18   :  { %353 = vmatpush.msra.mxu1 %v66_v38 }
  0x19   :  { %82 = vmatpush.msra.mxu0 %v65_v41 }
  0x1a   :  { %354 = vmatpush.msra.mxu1 %v65_v41 }
  0x1b   :  { %83 = vmatpush.msra.mxu0 %v64_v45 }
  0x1c   :  { %355 = vmatpush.msra.mxu1 %v64_v45 }
  0x1d   :  { %84 = vmatpush.msra.mxu0 %v63_v46 }
  0x1e   :  { %356 = vmatpush.msra.mxu1 %v63_v46 }
  0x1f   :  { %85 = vmatpush.msra.mxu0 %v62_v47 }
  0x20   :  { %357 = vmatpush.msra.mxu1 %v62_v47 }
  0x21   :  { %86 = vmatpush.msra.mxu0 %v61_v48 }
  0x22   :  { %358 = vmatpush.msra.mxu1 %v61_v48 }
  0x23   :  { %108 = vperm.xlu0 %372, %v103_v4   ;;  %87 = vmatpush.msra.mxu0 %v60_v49 }
  0x24   :  { %359 = vmatpush.msra.mxu1 %v60_v49 }
  0x25   :  { %88 = vmatpush.msra.mxu0 %v59_v50 }
  0x26   :  { %360 = vmatpush.msra.mxu1 %v59_v50 }
  0x27   :  { %89 = vmatpush.msra.mxu0 %v58_v51 }
  0x28   :  { %361 = vmatpush.msra.mxu1 %v58_v51 }
  0x68   :  { %v171_v12 = vpop.permute.xlu2 %170 }
  0x69   :  { %v176_v13 = vsub.f32 %v103_v4, %v171_v12  ;;  %v178_v14 = vadd.f32 %v171_v12, %v103_v4 }
  0x6b   :  { %v514_v15 = vsub.f32 %v178_v14, %v176_v13  ;;  %208 = vperm.xlu0 %372, %v178_v14  }
  0x6d   :  { %190 = vrot.lane.b32.xlu2 %v514_v15, %s461_s0 }
  0x70   :  { %v173_v16 = vpop.permute.xlu2 %172 }
  0x71   :  { %v177_v17 = vsub.f32 %v508_v8, %v173_v16  ;;  %v179_v18 = vadd.f32 %v173_v16, %v508_v8 }
  0x73   :  { %v519_v19 = vsub.f32 %v179_v18, %v177_v17  ;;  %226 = vperm.xlu0 %372, %v177_v17  }
  0x75   :  { %192 = vrot.lane.b32.xlu2 %v519_v19, %s461_s0 }
  0x7a   :  { %v37_v20 = vpop.xlane.xlu0 %36 }
  0x7b   :  { %382 = vset.pattern.permute.xlu0 %v460_v11  ;;  %v40_v21 = vsub.f32 %v34_v0, %v37_v20 }
  0x7c   :  { %248 = vperm.xlu0 %382, %v176_v13  }
  0x7d   :  { %122 = vperm.xlu2 %374, %v103_v4   ;;  %v42_v22 = vmul.f32 1.442695, %v40_v21 }
  0x7f   :  { %387 = vpow2.f32 %v42_v22 }
  0x82   :  { %v39_v23 = vpop.xlane.xlu0 %38 }
  0x83   :  { %v41_v24 = vsub.f32 %v35_v7, %v39_v23  ;;  %v180_v7 = vmul.f32 0.5, %v561_v6 }
  0x84   :  { %386 = vset.pattern.permute.xlu0 %v459_v10 }
  0x85   :  { %126 = vperm.xlu2 %374, %v508_v8   ;;  %v525_v25 = vpop.eup %387  ;;  %v44_v26 = vmul.f32 1.442695, %v41_v24 }
  0x86   :  { %46 = vadd.xlane.f32.xlu1 %v525_v25 }
  0x87   :  { %389 = vpow2.f32 %v44_v26 }
  0x8d   :  { %376 = vset.pattern.permute.xlu2 %v462_v27  ;;  %v528_v28 = vpop.eup %389 }
  0x8e   :  { %141 = vperm.xlu2 %376, %v508_v8   ;;  %48 = vadd.xlane.f32.xlu1 %v528_v28 }
  0x95   :  { %v550_v1 = vpop.permute.xlu0 %108 }
  0x96   :  { %378 = vset.pattern.permute.xlu2 %v459_v10 }
  0x97   :  { %213 = vperm.xlu2 %378, %v179_v18  }
  0x9f   :  { %380 = vset.pattern.permute.xlu2 %v460_v11 }
  0xa0   :  { %237 = vperm.xlu2 %380, %v178_v14  }
  0xa7   :  { %113 = vperm.xlu1 %373, %v508_v8  }
  0xa8   :  { %252 = vperm.xlu2 %380, %v177_v17  }
  0xaf   :  { %375 = vset.pattern.permute.xlu1 %v462_v27 }
  0xb0   :  { %384 = vset.pattern.permute.xlu2 %v459_v10  ;;  %137 = vperm.xlu1 %375, %v103_v4  }
  0xb8   :  { %377 = vset.pattern.permute.xlu1 %v463_v29 }
  0xb9   :  { %152 = vperm.xlu1 %377, %v103_v4  }
  0xc1   :  { %379 = vset.pattern.permute.xlu1 %v459_v10 }
  0xc2   :  { %221 = vperm.xlu1 %379, %v176_v13  }
  0xc7   :  { %v191_v35 = vpop.permute.xlu2 %190 }
  0xc8   :  { %v196_v39 = vmul.f32 %v191_v35, %v514_v15 }
  0xca   :  { %381 = vset.pattern.permute.xlu1 %v460_v11  ;;  %v198_v44 = vmax.f32 %v196_v39, 0.0 }
  0xcb   :  { %241 = vperm.xlu1 %381, %v179_v18  }
  0xcf   :  { %v193_v40 = vpop.permute.xlu2 %192 }
  0xd0   :  { %v197_v42 = vmul.f32 %v193_v40, %v519_v19 }
  0xd2   :  { %v199_v43 = vmax.f32 %v197_v42, 0.0 }
  0xd3   :  { %383 = vset.pattern.permute.xlu1 %v459_v10  ;;  %v182_v10 = vrot.slane %v180_v7, 2  ;;  %v116_v7 = vperm.slane %v561_v6, 0 }
  0xd4   :  { %273 = vperm.xlu2 %384, %v199_v43   ;;  %268 = vperm.xlu1 %383, %v198_v44  }
  0xd5   :  { %v185_v12 = vadd.f32 %v182_v10, %v561_v6  ;;  %v184_v13 = vsub.f32 %v561_v6, %v182_v10 }
  0xd7   :  { %v544_v62 = vpop.permute.xlu2 %122  ;;  %v200_v14 = vsub.f32 %v185_v12, %v184_v13  ;;  %v216_v16 = vperm.slane %v185_v12, 0  ;;  %v229_v17 = vperm.slane %v184_v13, 0  ;;  %v244_v18 = vperm.slane %v185_v12, 1 }
  0xd8   :  { %v255_v19 = vperm.slane %v184_v13, 1 }
  0xd9   :  { %v202_v21 = vrot.slane %v200_v14, 1 }
  0xdb   :  { %v204_v27 = vmul.f32 %v202_v21, %v200_v14 }
  0xdc   :  { %385 = vset.pattern.permute.xlu1 %v463_v29 }
  0xdd   :  { %156 = vperm.xlu1 %385, %v508_v8   ;;  %v209_v4 = vpop.permute.xlu0 %208  ;;  %v205_v35 = vmax.f32 %v204_v27, 0.0 }
  0xde   :  { %v217_v24 = vmin.f32 %v209_v4, %v216_v16  ;;  %v283_v40 = vmax.f32 %v209_v4, %v216_v16  ;;  %v129_v4 = vperm.slane %v561_v6, 1 }
  0xdf   :  { %v548_v0 = vpop.permute.xlu2 %126  ;;  %v276_v45 = vperm.slane %v205_v35, 0 }
  0xe5   :  { %v227_v9 = vpop.permute.xlu0 %226 }
  0xe6   :  { %v231_v32 = vmax.f32 %v227_v9, %v229_v17 }
  0xe8   :  { %v554_v3 = vpop.permute.xlu2 %141 }
  0xee   :  { %v249_v20 = vpop.permute.xlu0 %248 }
  0xef   :  { %v256_v26 = vmax.f32 %v249_v20, %v255_v19  ;;  %v293_v41 = vmin.f32 %v249_v20, %v255_v19 }
  0xf1   :  { %v214_v8 = vpop.permute.xlu2 %213 }
  0xf2   :  { %v218_v33 = vmin.f32 %v214_v8, %v216_v16 }
  0xf4   :  { %v233_v43 = vsub.f32 %v218_v33, %v231_v32 }
  0xf6   :  { %v235_v50 = vmax.f32 %v233_v43, 0.0 }
  0xf9   :  { %v47_v52 = vpop.xlane.xlu1 %46 }
  0xfa   :  { %391 = vrcp.f32 %v47_v52  ;;  %v238_v15 = vpop.permute.xlu2 %237 }
  0xfb   :  { %v291_v44 = vmax.f32 %v238_v15, %v244_v18 }
  0xfd   :  { %v295_v51 = vsub.f32 %v291_v44, %v293_v41 }
 0x100   :  { %v392_v53 = vpop.eup %391 }
 0x101   :  { %v49_v54 = vpop.xlane.xlu1 %48  ;;  %v52_v55 = vmul.f32 %v392_v53, %v525_v25  ;;  %v245_v25 = vmin.f32 %v238_v15, %v244_v18 }
 0x102   :  { %393 = vrcp.f32 %v49_v54  ;;  %v253_v29 = vpop.permute.xlu2 %252  ;;  %v284_v54 = vmax.f32 %v214_v8, %v216_v16  ;;  %v130_v8 = vsub.f32 %v544_v62, %v129_v4  ;;  %v144_v16 = vperm.slane %v561_v6, 2 }
 0x103   :  { %v54_v56 = vmax.f32 %v52_v55, 0.0001  ;;  %v258_v30 = vsub.f32 %v245_v25, %v256_v26  ;;  %v257_v34 = vmax.f32 %v253_v29, %v255_v19  ;;  %v286_v55 = vmin.f32 %v227_v9, %v229_v17 }
 0x104   :  { %v117_v9 = vsub.f32 %v550_v1, %v116_v7  ;;  %v159_v25 = vperm.slane %v561_v6, 3 }
 0x105   :  { %v56_v57 = vmin.f32 %v54_v56, 0.9999  ;;  %v260_v37 = vmax.f32 %v258_v30, 0.0  ;;  %v294_v56 = vmin.f32 %v253_v29, %v255_v19 }
 0x107   :  { %90 = vmatmul.f32.vlgmr.msra.gmra.mxu0 %v56_v57 }
 0x108   :  { %v394_v58 = vpop.eup %393 }
 0x109   :  { %v53_v59 = vmul.f32 %v394_v58, %v528_v28 }
 0x10b   :  { %v55_v60 = vmax.f32 %v53_v59, 0.0001 }
 0x10d   :  { %v57_v61 = vmin.f32 %v55_v60, 0.9999  ;;  %v297_v60 = vmax.f32 %v295_v51, 0.0 }
 0x10f   :  { %93 = vmatmul.f32.vlgmr.msra.gmra.mxu1 %v57_v61 }
 0x119   :  { %v546_v63 = vpop.permute.xlu1 %113 }
 0x11a   :  { %v118_v32 = vsub.f32 %v546_v63, %v116_v7 }
 0x122   :  { %v552_v2 = vpop.permute.xlu1 %137 }
 0x12b   :  { %v556_v5 = vpop.permute.xlu1 %152 }
 0x12c   :  { %v160_v1 = vsub.f32 %v556_v5, %v159_v25 }
 0x12e   :  { %v274_v10 = vpop.permute.xlu2 %273  ;;  %v162_v35 = vand.u32 2147483647, %v160_v1 }
 0x12f   :  { %v278_v15 = vadd.f32 %v276_v45, %v274_v10 }
 0x134   :  { %v222_v11 = vpop.permute.xlu1 %221 }
 0x135   :  { %v230_v22 = vmax.f32 %v222_v11, %v229_v17  ;;  %v285_v38 = vmin.f32 %v222_v11, %v229_v17  ;;  %v288_v11 = vsub.f32 %v284_v54, %v286_v55 }
 0x137   :  { %v232_v28 = vsub.f32 %v217_v24, %v230_v22  ;;  %v287_v47 = vsub.f32 %v283_v40, %v285_v38  ;;  %v290_v17 = vmax.f32 %v288_v11, 0.0  ;;  %v132_v22 = vand.u32 2147483647, %v130_v8 }
 0x138   :  { %v145_v24 = vsub.f32 %v552_v2, %v144_v16  ;;  %v146_v38 = vsub.f32 %v554_v3, %v144_v16 }
 0x139   :  { %v234_v36 = vmax.f32 %v232_v28, 0.0  ;;  %v289_v57 = vmax.f32 %v287_v47, 0.0 }
 0x13a   :  { %v147_v29 = vand.u32 2147483647, %v145_v24 }
 0x13b   :  { %v262_v46 = vmul.f32 %v260_v37, %v234_v36  ;;  %v299_v12 = vmul.f32 %v297_v60, %v289_v57 }
 0x13d   :  { %v242_v23 = vpop.permute.xlu1 %241  ;;  %v264_v53 = vmax.f32 %v262_v46, 0.0  ;;  %v301_v19 = vmax.f32 %v299_v12, 0.0001 }
 0x13e   :  { %v246_v31 = vmin.f32 %v242_v23, %v244_v18  ;;  %v292_v52 = vmax.f32 %v242_v23, %v244_v18  ;;  %v119_v23 = vand.u32 2147483647, %v117_v9 }
 0x140   :  { %v259_v39 = vsub.f32 %v246_v31, %v257_v34  ;;  %v296_v61 = vsub.f32 %v292_v52, %v294_v56  ;;  %v134_v62 = vadd.f32 %v132_v22, %v119_v23  ;;  %v131_v31 = vsub.f32 %v548_v0, %v129_v4 }
 0x141   :  { %v148_v0 = vand.u32 2147483647, %v146_v38 }
 0x142   :  { %v261_v48 = vmax.f32 %v259_v39, 0.0  ;;  %v298_v18 = vmax.f32 %v296_v61, 0.0  ;;  %v149_v2 = vadd.f32 %v147_v29, %v134_v62  ;;  %v133_v37 = vand.u32 2147483647, %v131_v31 }
 0x143   :  { %v120_v39 = vand.u32 2147483647, %v118_v32 }
 0x144   :  { %v263_v58 = vmul.f32 %v261_v48, %v235_v50  ;;  %v300_v21 = vmul.f32 %v298_v18, %v290_v17  ;;  %v164_v5 = vadd.f32 %v162_v35, %v149_v2 }
 0x146   :  { %v269_v42 = vpop.permute.xlu1 %268  ;;  %v265_v13 = vmax.f32 %v263_v58, 0.0  ;;  %v302_v28 = vmax.f32 %v300_v21, 0.0001  ;;  %v315_v48 = vmul.f32 5.0, %v164_v5 }
 0x147   :  { %v277_v49 = vadd.f32 %v276_v45, %v269_v42  ;;  %v135_v45 = vadd.f32 %v133_v37, %v120_v39 }
 0x148   :  { %v280_v20 = vsub.f32 %v278_v15, %v265_v13 }
 0x149   :  { %v279_v59 = vsub.f32 %v277_v49, %v264_v53  ;;  %v150_v52 = vadd.f32 %v148_v0, %v135_v45 }
 0x14a   :  { %v282_v26 = vmax.f32 %v280_v20, 0.0001 }
 0x14b   :  { %v281_v14 = vmax.f32 %v279_v59, 0.0001 }
 0x14c   :  { %v308_v42 = vsub.f32 %v302_v28, %v282_v26 }
 0x14d   :  { %395 = vrcp.f32 %v281_v14  ;;  %v307_v30 = vsub.f32 %v301_v19, %v281_v14 }
 0x14e   :  { %397 = vrcp.f32 %v301_v19 }
 0x14f   :  { %399 = vrcp.f32 %v282_v26  ;;  %v157_v36 = vpop.permute.xlu1 %156 }
 0x150   :  { %401 = vrcp.f32 %v302_v28  ;;  %v161_v43 = vsub.f32 %v157_v36, %v159_v25 }
 0x152   :  { %v163_v49 = vand.u32 2147483647, %v161_v43 }
 0x153   :  { %v396_v27 = vpop.eup %395 }
 0x154   :  { %v305_v33 = vmul.f32 %v396_v27, %v264_v53  ;;  %v398_v34 = vpop.eup %397  ;;  %v165_v55 = vadd.f32 %v163_v49, %v150_v52 }
 0x155   :  { %v311_v6 = vmul.f32 %v398_v34, %v307_v30  ;;  %v400_v41 = vpop.eup %399 }
 0x156   :  { %v402_v44 = vpop.eup %401  ;;  %v306_v46 = vmul.f32 %v400_v41, %v265_v13  ;;  %v316_v59 = vmul.f32 5.0, %v165_v55 }
 0x157   :  { %v313_v40 = vsub.f32 %v305_v33, %v311_v6  ;;  %v312_v51 = vmul.f32 %v402_v44, %v308_v42 }
 0x159   :  { %v319_v63 = vsub.f32 0.0, %v313_v40  ;;  %v314_v3 = vsub.f32 %v306_v46, %v312_v51 }
 0x15b   :  { %v321_v54 = vmul.f32 2.0, %v319_v63  ;;  %v320_v57 = vsub.f32 0.0, %v314_v3 }
 0x15d   :  { %v322_v4 = vmul.f32 2.0, %v320_v57 }
 0x184   :  { %v91_v47 = vpop.f32.mrf.mxu0 }
 0x185   :  { %v97_v50 = vsub.f32 0.0, %v91_v47 }
 0x187   :  { %v317_v53 = vadd.f32 %v315_v48, %v97_v50 }
 0x189   :  { %v323_v56 = vadd.f32 %v321_v54, %v317_v53 }
 0x18b   :  { %325 = vst [vmem:[#allocation5] sm:$0xff] %v323_v56 }
 0x18c   :  { %v94_v58 = vpop.f32.mrf.mxu1 }
 0x18d   :  { %v98_v60 = vsub.f32 0.0, %v94_v58 }
 0x18f   :  { %v318_v61 = vadd.f32 %v316_v59, %v98_v60 }
 0x191   :  { %v324_v7 = vadd.f32 %v322_v4, %v318_v61 }
 0x193   :  { %326 = vst [vmem:[#allocation5 + $0x8] sm:$0xff] %v324_v7 }
 0x194   :  { %339 = dma.vmem_to_hbm [thread:$0]  %s332_s5, 256, %s334_s8, [#allocation4], %s456_s20, %s456_s20, %s457_s21  }
 0x195   :  { %453 = dma.done.wait [#allocation4], 256  }
 0x196   :  { %454 = vsyncadd [#allocation4], 4294967040 }
 0x197   :  { %344 = vsyncpa [#allocation3], 1 }
 0x198   :  { %345 = vsyncpa [#allocation4], 1 }

</bundles_post_ra>
